<compile_context>
chip_gen: v5e
topology: v5e:2x2
jax: 0.10.0
libtpu: 0.0.40
codegen_flags: <defaults>
</compile_context>

<pallas_src>
import jax
import jax.numpy as jnp
from jax.experimental import pallas as pl
from jax.experimental.pallas import tpu as pltpu

EPS = 1e-5


def _residual_block_kernel(s1_ref, w1s_ref, w2_ref, sh_ref, foldm_ref,
                           bcast_ref, gb_ref, o_ref):
    NH, WCO = o_ref.shape          # NH = N*H rows, WCO = W*Cout lane-dense width
    C = gb_ref.shape[-1]

    gb = gb_ref[...]               # packed (5, C): g1, be1, g2, be2, bs
    g1, be1 = gb[0:1, :], gb[1:2, :]
    g2, be2 = gb[2:3, :], gb[3:4, :]
    bs_c = gb[4:5, :]
    foldm = foldm_ref[...]         # (WCO, C), pre-scaled by 1/(N*H*W)
    bcast = bcast_ref[...]         # (C, WCO)

    def bn_scale_shift(y, g, be):
        # Training-mode BN as fused per-channel scale/shift on the lane-dense
        # (N*H, W*C) layout.  One dot for both moments.
        rs = jnp.sum(y, axis=0, keepdims=True)            # (1, WCO)
        rss = jnp.sum(y * y, axis=0, keepdims=True)       # (1, WCO)
        two_row = jax.lax.broadcasted_iota(jnp.int32, (2, WCO), 0) == 0
        stats = jnp.where(two_row, rs, rss)               # (2, WCO), no concat
        mom = jnp.dot(stats, foldm,
                      preferred_element_type=jnp.float32)  # (2, C) = [mean; E[x^2]]
        mean = mom[0:1, :]
        var = mom[1:2, :] - mean * mean                    # biased variance
        s = g * jax.lax.rsqrt(var + EPS)                   # (1, C)
        t = be - mean * s                                  # (1, C)
        return s, t

    # ---- conv1 (3x3, pad 1) + 1x1 shortcut: ONE fused lane-dense matmul ----
    y1r = jnp.dot(s1_ref[...], w1s_ref[...],
                  preferred_element_type=jnp.float32)      # (NH, 2*WCO)
    y1 = y1r[:, :WCO]                                      # conv1 output rows
    res = y1r[:, WCO:]                                     # shortcut rows (no bias yet)

    # ---- bn1 (fused scale/shift) + relu ----
    s1v, t1v = bn_scale_shift(y1, g1, be1)
    row2 = jax.lax.broadcasted_iota(jnp.int32, (2, C), 0)
    st1 = jnp.where(row2 == 0, s1v, t1v)                   # (2, C)
    st1r = jnp.dot(st1, bcast,
                   preferred_element_type=jnp.float32)     # (2, WCO)
    h1 = jnp.maximum(y1 * st1r[0:1, :] + st1r[1:2, :], 0.0)

    # ---- conv2 (3x3, pad 1): block-shift matmul for the +/-1 row taps, then
    #      one K = 3*WCO matmul (no padded scratch, no sublane-offset copies) --
    tb = jnp.dot(sh_ref[...], h1,
                 preferred_element_type=jnp.float32)       # (2*NH, WCO): [up; down]
    slab2 = jnp.concatenate([tb[0:NH, :], h1, tb[NH:2 * NH, :]],
                            axis=-1)                        # (NH, 3*WCO), 128-aligned
    y2 = jnp.dot(slab2, w2_ref[...],
                 preferred_element_type=jnp.float32)        # (NH, WCO)

    # ---- bn2 scale/shift (+ shortcut bias row via the same broadcast dot) ----
    s2v, t2v = bn_scale_shift(y2, g2, be2)
    row3 = jax.lax.broadcasted_iota(jnp.int32, (3, C), 0)
    stb = jnp.where(row3 == 0, s2v, jnp.where(row3 == 1, t2v, bs_c))  # (3, C)
    stbr = jnp.dot(stb, bcast,
                   preferred_element_type=jnp.float32)      # (3, WCO): s2, t2, bs rows

    # ---- bn2 apply + residual add + relu, lane-dense store ----
    out = jnp.maximum(y2 * stbr[0:1, :] + stbr[1:2, :] + res + stbr[2:3, :], 0.0)
    o_ref[...] = out


def _banded_conv_weight(w, W):
    """HWIO (3,3,Ci,Co) -> (3, W*Ci, W*Co).

    Per vertical tap ky, a banded matrix folding the 3 horizontal taps and the
    W-direction 'same' padding, so a 3x3 conv over flattened rows is just
    sum_ky rows[h+ky-1] @ band[ky]."""
    K, _, Ci, Co = w.shape
    dx = jnp.arange(W)[:, None] - jnp.arange(W)[None, :] + 1     # (W_in, W_out)
    valid = (dx >= 0) & (dx < K)
    wg = w[:, jnp.clip(dx, 0, K - 1), :, :]                      # (K, W_in, W_out, Ci, Co)
    wg = jnp.where(valid[None, :, :, None, None], wg, 0.0)
    band = jnp.transpose(wg, (0, 1, 3, 2, 4))                    # (K, W_in, Ci, W_out, Co)
    return band.reshape(K, W * Ci, W * Co)


def residual_block_pallas(x_nchw, params):
    """x_nchw: (N, Cin, H, W) float32. Returns (N, Cout, H, W)."""
    w1, b1, g1, be1, w2, b2, g2, be2, ws, bs = params
    # NOTE: b1/b2 are intentionally NOT passed to the kernel — training-mode BN
    # subtracts the batch mean immediately after each conv, which cancels any
    # per-channel bias exactly.
    # TODO(synk): eval-mode BN (running statistics) would need b1/b2 restored
    # and the stats replaced by running buffers.
    N, Cin, H, W = x_nchw.shape
    Cout = w1.shape[-1]
    f32 = jnp.float32
    NH, WCI, WCO = N * H, W * Cin, W * Cout

    # ---- glue (XLA): layout, row-im2col slab, fused / banded weights ----
    x_nhwc = jnp.transpose(x_nchw, (0, 2, 3, 1)).astype(f32)         # (N,H,W,Cin)
    x_hpad = jnp.pad(x_nhwc, ((0, 0), (1, 1), (0, 0), (0, 0)))       # pad H only
    xrow = x_hpad.reshape(N, H + 2, WCI)
    s1 = jnp.concatenate([xrow[:, dy:dy + H, :] for dy in range(3)], axis=-1)
    s1 = s1.reshape(NH, 3 * WCI)                                     # conv1 im2col slab

    # Fused conv1 + shortcut weight: cols [0:WCO] = banded conv1, cols
    # [WCO:2*WCO] get the block-diagonal 1x1 shortcut on the middle-tap rows
    # (those rows of s1 are exactly the un-shifted input rows).
    w1b = _banded_conv_weight(w1.astype(f32), W).reshape(3 * WCI, WCO)
    wsb = jnp.einsum('wv,ic->wivc', jnp.eye(W, dtype=f32),
                     ws.astype(f32)).reshape(WCI, WCO)               # block-diag 1x1
    w1s = jnp.zeros((3 * WCI, 2 * WCO), f32)
    w1s = w1s.at[:, :WCO].set(w1b)
    w1s = w1s.at[WCI:2 * WCI, WCO:].set(wsb)

    w2cat = _banded_conv_weight(w2.astype(f32), W).reshape(3 * WCO, WCO)

    # Exact 0/1 vertical-shift matrices (per-image zero padding built in):
    # (S_top @ h)[r] = h[r-1] within the same image else 0; S_bot analogous.
    r = jnp.arange(NH)
    s_top = ((r[None, :] == r[:, None] - 1) &
             ((r % H) != 0)[:, None]).astype(f32)                    # (NH, NH)
    s_bot = ((r[None, :] == r[:, None] + 1) &
             ((r % H) != H - 1)[:, None]).astype(f32)                # (NH, NH)
    sh = jnp.concatenate([s_top, s_bot], axis=0)                     # (2*NH, NH)

    fold = jnp.tile(jnp.eye(Cout, dtype=f32), (W, 1))                # (WCO, Cout)
    foldm = fold * (1.0 / (N * H * W))                               # pre-scaled fold
    bcast = fold.T                                                   # (Cout, WCO)

    # Packed small params: g1, be1, g2, be2, shortcut bias.
    gb = jnp.stack([g1, be1, g2, be2, bs]).astype(f32)               # (5, Cout)

    flops = (2 * NH * (3 * WCI) * (2 * WCO)          # fused conv1 + shortcut
             + 2 * (2 * NH) * NH * WCO               # vertical shift matmul
             + 2 * NH * (3 * WCO) * WCO              # conv2 (single K-concat matmul)
             + 2 * (2 * 2 * WCO * Cout + (2 + 3) * Cout * WCO)  # BN micro-dots
             + 12 * NH * WCO)                        # BN apply / relu / add
    bytes_accessed = 4 * (s1.size + w1s.size + w2cat.size + sh.size
                          + foldm.size + bcast.size + gb.size + NH * WCO)

    vmem = pl.BlockSpec(memory_space=pltpu.MemorySpace.VMEM)
    out_rows = pl.pallas_call(
        _residual_block_kernel,
        out_shape=jax.ShapeDtypeStruct((NH, WCO), f32),
        in_specs=[vmem] * 7,
        out_specs=vmem,
        compiler_params=pltpu.CompilerParams(vmem_limit_bytes=32 * 1024 * 1024),
        cost_estimate=pl.CostEstimate(flops=int(flops),
                                      transcendentals=int(2 * Cout),
                                      bytes_accessed=int(bytes_accessed)),
    )(s1, w1s, w2cat, sh, foldm, bcast, gb)

    out_nhwc = out_rows.reshape(N, H, W, Cout)
    return jnp.transpose(out_nhwc, (0, 3, 1, 2))


def residual_block_ref(x_nchw, params):
    """Pure-JAX reference (same math, incl. the mathematically-dead conv biases)."""
    w1, b1, g1, be1, w2, b2, g2, be2, ws, bs = params
    x = jnp.transpose(x_nchw, (0, 2, 3, 1)).astype(jnp.float32)

    def conv(x, w, b, pad):
        y = jax.lax.conv_general_dilated(
            x, w, (1, 1), [(pad, pad), (pad, pad)],
            dimension_numbers=('NHWC', 'HWIO', 'NHWC'))
        return y + b

    def bn(x, g, be):
        m = x.mean(axis=(0, 1, 2))
        v = ((x - m) ** 2).mean(axis=(0, 1, 2))
        return (x - m) * jax.lax.rsqrt(v + EPS) * g + be

    h = jax.nn.relu(bn(conv(x, w1, b1, 1), g1, be1))
    h2 = bn(conv(h, w2, b2, 1), g2, be2)
    res = conv(x, ws.reshape(1, 1, *ws.shape), bs, 0)
    out = jax.nn.relu(h2 + res)
    return jnp.transpose(out, (0, 3, 1, 2))


def init_params(key, cin, cout):
    ks = jax.random.split(key, 6)
    w1 = jax.random.normal(ks[0], (3, 3, cin, cout), jnp.float32) * 0.1   # HWIO
    b1 = jax.random.normal(ks[1], (cout,), jnp.float32) * 0.1
    w2 = jax.random.normal(ks[2], (3, 3, cout, cout), jnp.float32) * 0.1
    b2 = jax.random.normal(ks[3], (cout,), jnp.float32) * 0.1
    ws = jax.random.normal(ks[4], (cin, cout), jnp.float32) * 0.1         # 1x1 shortcut
    bs = jax.random.normal(ks[5], (cout,), jnp.float32) * 0.1
    # BatchNorm affine params at PyTorch defaults
    g1 = jnp.ones((cout,), jnp.float32)
    be1 = jnp.zeros((cout,), jnp.float32)
    g2 = jnp.ones((cout,), jnp.float32)
    be2 = jnp.zeros((cout,), jnp.float32)
    return (w1, b1, g1, be1, w2, b2, g2, be2, ws, bs)


if __name__ == "__main__":
    N, Cin, Cout, H, W = 2, 4, 8, 16, 16
    key = jax.random.PRNGKey(0)
    kx, kp = jax.random.split(key)
    x = jax.random.normal(kx, (N, Cin, H, W), jnp.float32)
    params = init_params(kp, Cin, Cout)

    out = residual_block_pallas(x, params)
    out = jax.block_until_ready(out)

    ref = jax.block_until_ready(residual_block_ref(x, params))
    assert out.shape == (N, Cout, H, W)
    assert jnp.allclose(out, ref, atol=2e-4, rtol=2e-4), \
        f"max abs err {jnp.max(jnp.abs(out - ref))}"

    print("KERNEL_OK")
</pallas_src>

<mosaic_0001>
module attributes {stable_mosaic.version = 11 : i64} {
  func.func @_residual_block_kernel(%arg0: memref<32x192xf32, #tpu.memory_space<vmem>>, %arg1: memref<192x256xf32, #tpu.memory_space<vmem>>, %arg2: memref<384x128xf32, #tpu.memory_space<vmem>>, %arg3: memref<64x32xf32, #tpu.memory_space<vmem>>, %arg4: memref<128x8xf32, #tpu.memory_space<vmem>>, %arg5: memref<8x128xf32, #tpu.memory_space<vmem>>, %arg6: memref<5x8xf32, #tpu.memory_space<vmem>>, %arg7: memref<32x128xf32, #tpu.memory_space<vmem>>) attributes {dimension_semantics = [], scalar_prefetch = 0 : i64, scratch_operands = 0 : i64, tpu.core_type = #tpu.core_type<tc>} {
    %c0 = arith.constant 0 : index
    %c0_0 = arith.constant 0 : index
    %0 = vector.load %arg6[%c0, %c0_0] : memref<5x8xf32, #tpu.memory_space<vmem>>, vector<5x8xf32>
    %1 = vector.extract_strided_slice %0 {offsets = [0, 0], sizes = [1, 8], strides = [1, 1]} : vector<5x8xf32> to vector<1x8xf32>
    %2 = vector.extract_strided_slice %0 {offsets = [1, 0], sizes = [1, 8], strides = [1, 1]} : vector<5x8xf32> to vector<1x8xf32>
    %3 = vector.extract_strided_slice %0 {offsets = [2, 0], sizes = [1, 8], strides = [1, 1]} : vector<5x8xf32> to vector<1x8xf32>
    %4 = vector.extract_strided_slice %0 {offsets = [3, 0], sizes = [1, 8], strides = [1, 1]} : vector<5x8xf32> to vector<1x8xf32>
    %5 = vector.extract_strided_slice %0 {offsets = [4, 0], sizes = [1, 8], strides = [1, 1]} : vector<5x8xf32> to vector<1x8xf32>
    %c0_1 = arith.constant 0 : index
    %c0_2 = arith.constant 0 : index
    %6 = vector.load %arg4[%c0_1, %c0_2] : memref<128x8xf32, #tpu.memory_space<vmem>>, vector<128x8xf32>
    %c0_3 = arith.constant 0 : index
    %c0_4 = arith.constant 0 : index
    %7 = vector.load %arg5[%c0_3, %c0_4] : memref<8x128xf32, #tpu.memory_space<vmem>>, vector<8x128xf32>
    %c0_5 = arith.constant 0 : index
    %c0_6 = arith.constant 0 : index
    %8 = vector.load %arg0[%c0_5, %c0_6] : memref<32x192xf32, #tpu.memory_space<vmem>>, vector<32x192xf32>
    %c0_7 = arith.constant 0 : index
    %c0_8 = arith.constant 0 : index
    %9 = vector.load %arg1[%c0_7, %c0_8] : memref<192x256xf32, #tpu.memory_space<vmem>>, vector<192x256xf32>
    %cst = arith.constant dense<0.000000e+00> : vector<32x256xf32>
    %10 = tpu.matmul %8, %9, %cst {dimension_numbers = #tpu.dot_dimension_numbers<[1], [0], [0], [1], [0, 0, 1, 1], [], []>} : vector<32x192xf32>, vector<192x256xf32>, vector<32x256xf32> -> vector<32x256xf32>
    %11 = vector.extract_strided_slice %10 {offsets = [0, 0], sizes = [32, 128], strides = [1, 1]} : vector<32x256xf32> to vector<32x128xf32>
    %12 = vector.extract_strided_slice %10 {offsets = [0, 128], sizes = [32, 128], strides = [1, 1]} : vector<32x256xf32> to vector<32x128xf32>
    %cst_9 = arith.constant dense<0.000000e+00> : vector<128xf32>
    %13 = vector.multi_reduction <add>, %11, %cst_9 [0] : vector<32x128xf32> to vector<128xf32>
    %14 = vector.shape_cast %13 : vector<128xf32> to vector<1x128xf32>
    %15 = arith.mulf %11, %11 : vector<32x128xf32>
    %cst_10 = arith.constant dense<0.000000e+00> : vector<128xf32>
    %16 = vector.multi_reduction <add>, %15, %cst_10 [0] : vector<32x128xf32> to vector<128xf32>
    %17 = vector.shape_cast %16 : vector<128xf32> to vector<1x128xf32>
    %18 = tpu.iota {dimensions = array<i32: 0>} : vector<2x128xi32>
    %c0_i32 = arith.constant 0 : i32
    %19 = vector.broadcast %c0_i32 : i32 to vector<2x128xi32>
    %20 = arith.cmpi eq, %18, %19 : vector<2x128xi32>
    %21 = vector.shape_cast %14 : vector<1x128xf32> to vector<1x128xf32>
    %22 = vector.broadcast %21 : vector<1x128xf32> to vector<2x128xf32>
    %23 = vector.shape_cast %17 : vector<1x128xf32> to vector<1x128xf32>
    %24 = vector.broadcast %23 : vector<1x128xf32> to vector<2x128xf32>
    %25 = arith.select %20, %22, %24 : vector<2x128xi1>, vector<2x128xf32>
    %cst_11 = arith.constant dense<0.000000e+00> : vector<2x8xf32>
    %26 = tpu.matmul %25, %6, %cst_11 {dimension_numbers = #tpu.dot_dimension_numbers<[1], [0], [0], [1], [0, 0, 1, 1], [], []>} : vector<2x128xf32>, vector<128x8xf32>, vector<2x8xf32> -> vector<2x8xf32>
    %27 = vector.extract_strided_slice %26 {offsets = [0, 0], sizes = [1, 8], strides = [1, 1]} : vector<2x8xf32> to vector<1x8xf32>
    %28 = vector.extract_strided_slice %26 {offsets = [1, 0], sizes = [1, 8], strides = [1, 1]} : vector<2x8xf32> to vector<1x8xf32>
    %29 = arith.mulf %27, %27 : vector<1x8xf32>
    %30 = arith.subf %28, %29 : vector<1x8xf32>
    %cst_12 = arith.constant 9.99999974E-6 : f32
    %31 = vector.broadcast %cst_12 : f32 to vector<1x8xf32>
    %32 = arith.addf %30, %31 : vector<1x8xf32>
    %33 = math.rsqrt %32 : vector<1x8xf32>
    %34 = arith.mulf %1, %33 : vector<1x8xf32>
    %35 = arith.mulf %27, %34 : vector<1x8xf32>
    %36 = arith.subf %2, %35 : vector<1x8xf32>
    %37 = tpu.iota {dimensions = array<i32: 0>} : vector<2x8xi32>
    %c0_i32_13 = arith.constant 0 : i32
    %38 = vector.broadcast %c0_i32_13 : i32 to vector<2x8xi32>
    %39 = arith.cmpi eq, %37, %38 : vector<2x8xi32>
    %40 = vector.shape_cast %34 : vector<1x8xf32> to vector<1x8xf32>
    %41 = vector.broadcast %40 : vector<1x8xf32> to vector<2x8xf32>
    %42 = vector.shape_cast %36 : vector<1x8xf32> to vector<1x8xf32>
    %43 = vector.broadcast %42 : vector<1x8xf32> to vector<2x8xf32>
    %44 = arith.select %39, %41, %43 : vector<2x8xi1>, vector<2x8xf32>
    %cst_14 = arith.constant dense<0.000000e+00> : vector<2x128xf32>
    %45 = tpu.matmul %44, %7, %cst_14 {dimension_numbers = #tpu.dot_dimension_numbers<[1], [0], [0], [1], [0, 0, 1, 1], [], []>} : vector<2x8xf32>, vector<8x128xf32>, vector<2x128xf32> -> vector<2x128xf32>
    %46 = vector.extract_strided_slice %45 {offsets = [0, 0], sizes = [1, 128], strides = [1, 1]} : vector<2x128xf32> to vector<1x128xf32>
    %47 = vector.broadcast %46 : vector<1x128xf32> to vector<32x128xf32>
    %48 = arith.mulf %11, %47 : vector<32x128xf32>
    %49 = vector.extract_strided_slice %45 {offsets = [1, 0], sizes = [1, 128], strides = [1, 1]} : vector<2x128xf32> to vector<1x128xf32>
    %50 = vector.broadcast %49 : vector<1x128xf32> to vector<32x128xf32>
    %51 = arith.addf %48, %50 : vector<32x128xf32>
    %cst_15 = arith.constant 0.000000e+00 : f32
    %52 = vector.broadcast %cst_15 : f32 to vector<32x128xf32>
    %53 = arith.maximumf %51, %52 : vector<32x128xf32>
    %c0_16 = arith.constant 0 : index
    %c0_17 = arith.constant 0 : index
    %54 = vector.load %arg3[%c0_16, %c0_17] : memref<64x32xf32, #tpu.memory_space<vmem>>, vector<64x32xf32>
    %cst_18 = arith.constant dense<0.000000e+00> : vector<64x128xf32>
    %55 = tpu.matmul %54, %53, %cst_18 {dimension_numbers = #tpu.dot_dimension_numbers<[1], [0], [0], [1], [0, 0, 1, 1], [], []>} : vector<64x32xf32>, vector<32x128xf32>, vector<64x128xf32> -> vector<64x128xf32>
    %56 = vector.extract_strided_slice %55 {offsets = [0, 0], sizes = [32, 128], strides = [1, 1]} : vector<64x128xf32> to vector<32x128xf32>
    %57 = vector.extract_strided_slice %55 {offsets = [32, 0], sizes = [32, 128], strides = [1, 1]} : vector<64x128xf32> to vector<32x128xf32>
    %58 = tpu.concatenate %56, %53, %57 in 1 : vector<32x128xf32>, vector<32x128xf32>, vector<32x128xf32> -> vector<32x384xf32>
    %c0_19 = arith.constant 0 : index
    %c0_20 = arith.constant 0 : index
    %59 = vector.load %arg2[%c0_19, %c0_20] : memref<384x128xf32, #tpu.memory_space<vmem>>, vector<384x128xf32>
    %cst_21 = arith.constant dense<0.000000e+00> : vector<32x128xf32>
    %60 = tpu.matmul %58, %59, %cst_21 {dimension_numbers = #tpu.dot_dimension_numbers<[1], [0], [0], [1], [0, 0, 1, 1], [], []>} : vector<32x384xf32>, vector<384x128xf32>, vector<32x128xf32> -> vector<32x128xf32>
    %cst_22 = arith.constant dense<0.000000e+00> : vector<128xf32>
    %61 = vector.multi_reduction <add>, %60, %cst_22 [0] : vector<32x128xf32> to vector<128xf32>
    %62 = vector.shape_cast %61 : vector<128xf32> to vector<1x128xf32>
    %63 = arith.mulf %60, %60 : vector<32x128xf32>
    %cst_23 = arith.constant dense<0.000000e+00> : vector<128xf32>
    %64 = vector.multi_reduction <add>, %63, %cst_23 [0] : vector<32x128xf32> to vector<128xf32>
    %65 = vector.shape_cast %64 : vector<128xf32> to vector<1x128xf32>
    %66 = tpu.iota {dimensions = array<i32: 0>} : vector<2x128xi32>
    %c0_i32_24 = arith.constant 0 : i32
    %67 = vector.broadcast %c0_i32_24 : i32 to vector<2x128xi32>
    %68 = arith.cmpi eq, %66, %67 : vector<2x128xi32>
    %69 = vector.shape_cast %62 : vector<1x128xf32> to vector<1x128xf32>
    %70 = vector.broadcast %69 : vector<1x128xf32> to vector<2x128xf32>
    %71 = vector.shape_cast %65 : vector<1x128xf32> to vector<1x128xf32>
    %72 = vector.broadcast %71 : vector<1x128xf32> to vector<2x128xf32>
    %73 = arith.select %68, %70, %72 : vector<2x128xi1>, vector<2x128xf32>
    %cst_25 = arith.constant dense<0.000000e+00> : vector<2x8xf32>
    %74 = tpu.matmul %73, %6, %cst_25 {dimension_numbers = #tpu.dot_dimension_numbers<[1], [0], [0], [1], [0, 0, 1, 1], [], []>} : vector<2x128xf32>, vector<128x8xf32>, vector<2x8xf32> -> vector<2x8xf32>
    %75 = vector.extract_strided_slice %74 {offsets = [0, 0], sizes = [1, 8], strides = [1, 1]} : vector<2x8xf32> to vector<1x8xf32>
    %76 = vector.extract_strided_slice %74 {offsets = [1, 0], sizes = [1, 8], strides = [1, 1]} : vector<2x8xf32> to vector<1x8xf32>
    %77 = arith.mulf %75, %75 : vector<1x8xf32>
    %78 = arith.subf %76, %77 : vector<1x8xf32>
    %cst_26 = arith.constant 9.99999974E-6 : f32
    %79 = vector.broadcast %cst_26 : f32 to vector<1x8xf32>
    %80 = arith.addf %78, %79 : vector<1x8xf32>
    %81 = math.rsqrt %80 : vector<1x8xf32>
    %82 = arith.mulf %3, %81 : vector<1x8xf32>
    %83 = arith.mulf %75, %82 : vector<1x8xf32>
    %84 = arith.subf %4, %83 : vector<1x8xf32>
    %85 = tpu.iota {dimensions = array<i32: 0>} : vector<3x8xi32>
    %c0_i32_27 = arith.constant 0 : i32
    %86 = vector.broadcast %c0_i32_27 : i32 to vector<3x8xi32>
    %87 = arith.cmpi eq, %85, %86 : vector<3x8xi32>
    %c1_i32 = arith.constant 1 : i32
    %88 = vector.broadcast %c1_i32 : i32 to vector<3x8xi32>
    %89 = arith.cmpi eq, %85, %88 : vector<3x8xi32>
    %90 = vector.shape_cast %84 : vector<1x8xf32> to vector<1x8xf32>
    %91 = vector.broadcast %90 : vector<1x8xf32> to vector<3x8xf32>
    %92 = vector.shape_cast %5 : vector<1x8xf32> to vector<1x8xf32>
    %93 = vector.broadcast %92 : vector<1x8xf32> to vector<3x8xf32>
    %94 = arith.select %89, %91, %93 : vector<3x8xi1>, vector<3x8xf32>
    %95 = vector.shape_cast %82 : vector<1x8xf32> to vector<1x8xf32>
    %96 = vector.broadcast %95 : vector<1x8xf32> to vector<3x8xf32>
    %97 = arith.select %87, %96, %94 : vector<3x8xi1>, vector<3x8xf32>
    %cst_28 = arith.constant dense<0.000000e+00> : vector<3x128xf32>
    %98 = tpu.matmul %97, %7, %cst_28 {dimension_numbers = #tpu.dot_dimension_numbers<[1], [0], [0], [1], [0, 0, 1, 1], [], []>} : vector<3x8xf32>, vector<8x128xf32>, vector<3x128xf32> -> vector<3x128xf32>
    %99 = vector.extract_strided_slice %98 {offsets = [0, 0], sizes = [1, 128], strides = [1, 1]} : vector<3x128xf32> to vector<1x128xf32>
    %100 = vector.broadcast %99 : vector<1x128xf32> to vector<32x128xf32>
    %101 = arith.mulf %60, %100 : vector<32x128xf32>
    %102 = vector.extract_strided_slice %98 {offsets = [1, 0], sizes = [1, 128], strides = [1, 1]} : vector<3x128xf32> to vector<1x128xf32>
    %103 = vector.broadcast %102 : vector<1x128xf32> to vector<32x128xf32>
    %104 = arith.addf %101, %103 : vector<32x128xf32>
    %105 = arith.addf %104, %12 : vector<32x128xf32>
    %106 = vector.extract_strided_slice %98 {offsets = [2, 0], sizes = [1, 128], strides = [1, 1]} : vector<3x128xf32> to vector<1x128xf32>
    %107 = vector.broadcast %106 : vector<1x128xf32> to vector<32x128xf32>
    %108 = arith.addf %105, %107 : vector<32x128xf32>
    %cst_29 = arith.constant 0.000000e+00 : f32
    %109 = vector.broadcast %cst_29 : f32 to vector<32x128xf32>
    %110 = arith.maximumf %108, %109 : vector<32x128xf32>
    %c0_30 = arith.constant 0 : index
    %c0_31 = arith.constant 0 : index
    %111 = vector.load %arg7[%c0_30, %c0_31] : memref<32x128xf32, #tpu.memory_space<vmem>>, vector<32x128xf32>
    tpu.vector_store %arg7[%c0_30, %c0_31], %110 {strides = array<i32>} : memref<32x128xf32, #tpu.memory_space<vmem>>, vector<32x128xf32>,
    return
  }
}

</mosaic_0001>

<bundles_post_ra>
// kernel: tpu_custom_call.1
= control target key start
LH: loop header
LB: loop body
LE: loop exit
PB: predicated region body
PF: predicated region fallthrough
CT: control target
= control target key end

     0   :  { %12 = vsyncpa [#allocation3], 0  ;;  %s1195_s0 = inlined_call_operand.vmem [shape: f32[32,192], index: 0, kind: input, shape index: {}]   ;;  %s1196_s1 = inlined_call_operand.hbm [shape: f32[192,256], index: 1, kind: input, shape index: {}]   ;;  %s1197_s2 = inlined_call_operand.hbm [shape: f32[384,128], index: 2, kind: input, shape index: {}]   ;;  %s1198_s3 = inlined_call_operand.vmem [shape: f32[64,32], index: 3, kind: input, shape index: {}]   ;;  %s1199_s4 = inlined_call_operand.vmem [shape: f32[128,8], index: 4, kind: input, shape index: {}]   ;;  %s1200_s5 = inlined_call_operand.vmem [shape: f32[8,128], index: 5, kind: input, shape index: {}]   ;;  %s1201_s6 = inlined_call_operand.vmem [shape: f32[5,8], index: 6, kind: input, shape index: {}]   ;;  %s1202_s7 = inlined_call_operand.hbm [shape: f32[32,128], index: 7, kind: output, shape index: {}]  }
   0x1   :  { %13 = vsyncpa [#allocation6], 0 }
   0x2   :  { %14 = vsyncpa [#allocation4], 0  ;;  %s21_s26 = sshll.u32 %s1196_s1, 4  ;;  %s837_s27 = smov [#allocation2]   ;;  %s22_s26 = int_to_ptr.hbm [resolvable:$true] %s21_s26 }
   0x3   :  { %s23_s28 = sshll.u32 %s837_s27, 4  ;;  %s34_s8 = sshll.u32 %s1197_s2, 4  ;;  %s24_s28 = int_to_ptr.vmem [resolvable:$true] %s23_s28  ;;  %s35_s8 = int_to_ptr.hbm [resolvable:$true] %s34_s8 }
   0x4   :  { %s838_s9 = smov 256   ;;  %s839_s10 = smov 16  }
   0x5   :  { %29 = dma.hbm_to_vmem [thread:$0]  %s22_s26, 6144, %s24_s28, [#allocation3], %s838_s9, %s838_s9, %s839_s10  }
   0x6   :  { %s840_s11 = smov [#allocation5]   ;;  %s841_s13 = smov 128  }
   0x7   :  { %s36_s12 = sshll.u32 %s840_s11, 4  ;;  %s842_s14 = smov 8   ;;  %s37_s12 = int_to_ptr.vmem [resolvable:$true] %s36_s12 }
   0x8   :  { %42 = dma.hbm_to_vmem [thread:$0]  %s35_s8, 6144, %s37_s12, [#allocation6], %s841_s13, %s841_s13, %s842_s14  }
   0x9   :  { %831 = dma.done.wait [#allocation3], 6144  }
   0xa   :  { %832 = vsyncadd [#allocation3], 4294961152 }
   0xb   :  { %833 = dma.done.wait [#allocation6], 6144  }
   0xc   :  { %834 = vsyncadd [#allocation6], 4294961152  ;;  %v115_v0 = vld [vmem:[#allocation2 + $0xf0] sm:$0xff]  ;;  %v113_v1 = vld [vmem:[#allocation2 + $0xe0] sm:$0xff]  ;;  %vm133_vm0 = vcmask 523264   ;;  %vm336_vm5 = vcmask 64512  }
   0xd   :  { %146 = vmatpush.msra.mxu0 %v115_v0  ;;  %v111_v2 = vld [vmem:[#allocation2 + $0xd0] sm:$0xff]  ;;  %v129_v4 = vld [vmem:[#allocation2 + $0x160] sm:$0xff]  ;;  %v896_v18 = vld [vmem:[%s1195_s0 + $0x8] sm:$0xff]  ;;  %vm382_vm6 = vcmask 261120   ;;  %s716_s10 = sshll.u32 %s1202_s7, 4  ;;  %s717_s10 = int_to_ptr.hbm [resolvable:$true] %s716_s10 }
   0xe   :  { %v131_v3 = vld [vmem:[#allocation2 + $0x170] sm:$0xff]  ;;  %v109_v5 = vld [vmem:[#allocation2 + $0xc0] sm:$0xff]  ;;  %v903_v23 = vld [vmem:[%s1195_s0 + $0x18] sm:$0xff] }
   0xf   :  { %147 = vmatpush.msra.mxu0 %v113_v1  ;;  %183 = vmatpush.msra.mxu1 %v131_v3  ;;  %v127_v6 = vld [vmem:[#allocation2 + $0x150] sm:$0xff]  ;;  %v125_v8 = vld [vmem:[#allocation2 + $0x140] sm:$0xff]  ;;  %v916_v27 = vld [vmem:[%s1195_s0 + $0x28] sm:$0xff] }
  0x10   :  { %v107_v7 = vld [vmem:[#allocation2 + $0xb0] sm:$0xff]  ;;  %v105_v9 = vld [vmem:[#allocation2 + $0xa0] sm:$0xff]  ;;  %v929_v29 = vld [vmem:[%s1195_s0 + $0x38] sm:$0xff] }
  0x11   :  { %148 = vmatpush.msra.mxu0 %v111_v2  ;;  %184 = vmatpush.msra.mxu1 %v129_v4  ;;  %v123_v10 = vld [vmem:[#allocation2 + $0x130] sm:$0xff]  ;;  %v121_v12 = vld [vmem:[#allocation2 + $0x120] sm:$0xff]  ;;  %v948_v32 = vld [vmem:[%s1199_s4 + $0x78] sm:$0xff] }
  0x12   :  { %v103_v11 = vld [vmem:[#allocation2 + $0x90] sm:$0xff]  ;;  %v101_v13 = vld [vmem:[#allocation2 + $0x80] sm:$0xff]  ;;  %v960_v34 = vld [vmem:[%s1199_s4 + $0x68] sm:$0xff] }
  0x13   :  { %149 = vmatpush.msra.mxu0 %v109_v5  ;;  %185 = vmatpush.msra.mxu1 %v127_v6  ;;  %v119_v14 = vld [vmem:[#allocation2 + $0x110] sm:$0xff]  ;;  %v117_v16 = vld [vmem:[#allocation2 + $0x100] sm:$0xff]  ;;  %v972_v36 = vld [vmem:[%s1199_s4 + $0x58] sm:$0xff] }
  0x14   :  { %v99_v15 = vld [vmem:[#allocation2 + $0x70] sm:$0xff]  ;;  %v97_v17 = vld [vmem:[#allocation2 + $0x60] sm:$0xff]  ;;  %v984_v39 = vld [vmem:[%s1199_s4 + $0x48] sm:$0xff] }
  0x15   :  { %150 = vmatpush.msra.mxu0 %v107_v7  ;;  %186 = vmatpush.msra.mxu1 %v125_v8  ;;  %v95_v19 = vld [vmem:[#allocation2 + $0x50] sm:$0xff]  ;;  %v93_v20 = vld [vmem:[#allocation2 + $0x40] sm:$0xff]  ;;  %v996_v41 = vld [vmem:[%s1199_s4 + $0x38] sm:$0xff] }
  0x16   :  { %v91_v21 = vld [vmem:[#allocation2 + $0x30] sm:$0xff]  ;;  %v89_v22 = vld [vmem:[#allocation2 + $0x20] sm:$0xff]  ;;  %v1008_v44 = vld [vmem:[%s1199_s4 + $0x28] sm:$0xff] }
  0x17   :  { %151 = vmatpush.msra.mxu0 %v105_v9  ;;  %187 = vmatpush.msra.mxu1 %v123_v10  ;;  %v87_v24 = vld [vmem:[#allocation2 + $0x10] sm:$0xff]  ;;  %v85_v25 = vld [vmem:[#allocation2] sm:$0xff]  ;;  %v1019_v47 = vld [vmem:[%s1199_s4 + $0x18] sm:$0xff] }
  0x18   :  { %v910_v26 = vld [vmem:[%s1195_s0] sm:$0xff]  ;;  %v923_v28 = vld [vmem:[%s1195_s0 + $0x10] sm:$0xff]  ;;  %v1031_v49 = vld [vmem:[%s1199_s4 + $0x8] sm:$0xff] }
  0x19   :  { %152 = vmatpush.msra.mxu0 %v103_v11  ;;  %188 = vmatpush.msra.mxu1 %v121_v12  ;;  %v936_v30 = vld [vmem:[%s1195_s0 + $0x20] sm:$0xff]  ;;  %v942_v31 = vld [vmem:[%s1195_s0 + $0x30] sm:$0xff]  ;;  %v116_v53 = vld [vmem:[#allocation2 + $0xf8] sm:$0xff] }
  0x1a   :  { %v954_v33 = vld [vmem:[%s1199_s4 + $0x70] sm:$0xff]  ;;  %v966_v35 = vld [vmem:[%s1199_s4 + $0x60] sm:$0xff]  ;;  %v114_v54 = vld [vmem:[#allocation2 + $0xe8] sm:$0xff]  ;;  %204 = vmatpush.msra.mxu2 %v116_v53 }
  0x1b   :  { %153 = vmatpush.msra.mxu0 %v101_v13  ;;  %189 = vmatpush.msra.mxu1 %v119_v14  ;;  %v978_v37 = vld [vmem:[%s1199_s4 + $0x50] sm:$0xff]  ;;  %v990_v40 = vld [vmem:[%s1199_s4 + $0x40] sm:$0xff]  ;;  %v112_v55 = vld [vmem:[#allocation2 + $0xd8] sm:$0xff] }
  0x1c   :  { %v1002_v42 = vld [vmem:[%s1199_s4 + $0x30] sm:$0xff]  ;;  %v1014_v45 = vld [vmem:[%s1199_s4 + $0x20] sm:$0xff]  ;;  %205 = vmatpush.msra.mxu2 %v114_v54  ;;  %v132_v56 = vld [vmem:[#allocation2 + $0x178] sm:$0xff] }
  0x1d   :  { %154 = vmatpush.msra.mxu0 %v99_v15  ;;  %190 = vmatpush.msra.mxu1 %v117_v16  ;;  %v1025_v48 = vld [vmem:[%s1199_s4 + $0x10] sm:$0xff]  ;;  %v1037_v51 = vld [vmem:[%s1199_s4] sm:$0xff]  ;;  %v130_v57 = vld [vmem:[#allocation2 + $0x168] sm:$0xff] }
  0x1e   :  { %730 = vmatmul.msk.f32.vlgmr.msra.gmra.mxu1 %vm133_vm0, %v896_v18  ;;  %v110_v59 = vld [vmem:[#allocation2 + $0xc8] sm:$0xff]  ;;  %241 = vmatpush.msra.mxu3 %v132_v56  ;;  %v128_v61 = vld [vmem:[#allocation2 + $0x158] sm:$0xff] }
  0x1f   :  { %155 = vmatpush.msra.mxu0 %v97_v17  ;;  %288 = vmatpush.msrb.mxu1 %v948_v32  ;;  %v108_v62 = vld [vmem:[#allocation2 + $0xb8] sm:$0xff]  ;;  %v126_v1 = vld [vmem:[#allocation2 + $0x148] sm:$0xff] }
  0x20   :  { %206 = vmatpush.msra.mxu2 %v112_v55  ;;  %242 = vmatpush.msra.mxu3 %v130_v57  ;;  %v106_v2 = vld [vmem:[#allocation2 + $0xa8] sm:$0xff]  ;;  %v104_v5 = vld [vmem:[#allocation2 + $0x98] sm:$0xff] }
  0x21   :  { %156 = vmatpush.msra.mxu0 %v95_v19  ;;  %289 = vmatpush.msrb.mxu1 %v954_v33  ;;  %v102_v10 = vld [vmem:[#allocation2 + $0x88] sm:$0xff]  ;;  %v100_v14 = vld [vmem:[#allocation2 + $0x78] sm:$0xff] }
  0x22   :  { %207 = vmatpush.msra.mxu2 %v110_v59  ;;  %243 = vmatpush.msra.mxu3 %v128_v61  ;;  %v98_v19 = vld [vmem:[#allocation2 + $0x68] sm:$0xff] }
  0x23   :  { %157 = vmatpush.msra.mxu0 %v93_v20  ;;  %290 = vmatpush.msrb.mxu1 %v960_v34 }
  0x24   :  { %208 = vmatpush.msra.mxu2 %v108_v62  ;;  %244 = vmatpush.msra.mxu3 %v126_v1  ;;  %v92_v62 = vld [vmem:[#allocation2 + $0x38] sm:$0xff] }
  0x25   :  { %158 = vmatpush.msra.mxu0 %v91_v21  ;;  %291 = vmatpush.msrb.mxu1 %v966_v35  ;;  %v124_v1 = vld [vmem:[#allocation2 + $0x138] sm:$0xff] }
  0x26   :  { %731 = vmatmul.msk.f32.gmra.mxu1 %vm133_vm0, %v903_v23  ;;  %209 = vmatpush.msra.mxu2 %v106_v2  ;;  %v90_v2 = vld [vmem:[#allocation2 + $0x28] sm:$0xff] }
  0x27   :  { %159 = vmatpush.msra.mxu0 %v89_v22  ;;  %292 = vmatpush.msrb.mxu1 %v972_v36  ;;  %v96_v22 = vld [vmem:[#allocation2 + $0x58] sm:$0xff] }
  0x28   :  { %210 = vmatpush.msra.mxu2 %v104_v5  ;;  %245 = vmatpush.msra.mxu3 %v124_v1  ;;  %v120_v5 = vld [vmem:[#allocation2 + $0x118] sm:$0xff] }
  0x29   :  { %160 = vmatpush.msra.mxu0 %v87_v24  ;;  %293 = vmatpush.msrb.mxu1 %v978_v37 }
  0x2a   :  { %211 = vmatpush.msra.mxu2 %v102_v10 }
  0x2b   :  { %161 = vmatpush.msra.mxu0 %v85_v25  ;;  %294 = vmatpush.msrb.mxu1 %v984_v39 }
  0x2c   :  { %162 = vmatmul.f32.vlgmr.msra.gmra.mxu0 %v910_v26  ;;  %212 = vmatpush.msra.mxu2 %v100_v14 }
  0x2d   :  { %295 = vmatpush.msrb.mxu1 %v990_v40 }
  0x2e   :  { %732 = vmatmul.msk.f32.gmra.mxu1 %vm133_vm0, %v916_v27  ;;  %213 = vmatpush.msra.mxu2 %v98_v19 }
  0x2f   :  { %296 = vmatpush.msrb.mxu1 %v996_v41 }
  0x30   :  { %214 = vmatpush.msra.mxu2 %v96_v22 }
  0x31   :  { %297 = vmatpush.msrb.mxu1 %v1002_v42 }
  0x33   :  { %298 = vmatpush.msrb.mxu1 %v1008_v44 }
  0x34   :  { %165 = vmatmul.f32.gmra.mxu0 %v923_v28 }
  0x35   :  { %299 = vmatpush.msrb.mxu1 %v1014_v45 }
  0x36   :  { %733 = vmatmul.msk.f32.gmra.mxu1 %vm133_vm0, %v929_v29 }
  0x37   :  { %300 = vmatpush.msrb.mxu1 %v1019_v47 }
  0x39   :  { %301 = vmatpush.msrb.mxu1 %v1025_v48 }
  0x3b   :  { %302 = vmatpush.msrb.mxu1 %v1031_v49 }
  0x3c   :  { %168 = vmatmul.f32.gmra.mxu0 %v936_v30 }
  0x3d   :  { %303 = vmatpush.msrb.mxu1 %v1037_v51 }
  0x44   :  { %171 = vmatmul.f32.gmra.mxu0 %v942_v31 }
  0x9b   :  { %v192_v38 = vpop.f32.mrf.mxu1 }
  0xa3   :  { %v195_v46 = vpop.f32.mrf.mxu1 }
  0xa9   :  { %v163_v43 = vpop.f32.mrf.mxu0 }
  0xaa   :  { %v1043_v63 = vadd.f32 %v192_v38, %v163_v43  ;;  %v284_v38 = vlaneseq  ;;  %v94_v43 = vld [vmem:[#allocation2 + $0x48] sm:$0xff] }
  0xab   :  { %v198_v52 = vpop.f32.mrf.mxu1  ;;  %215 = vmatpush.msra.mxu2 %v94_v43  ;;  %v477_v43 = vld [vmem:[#allocation5 + $0xe8] sm:$0xff] }
  0xac   :  { %v271_v6 = vmul.f32 %v1043_v63, %v1043_v63  ;;  %v1061_v54 = vshrl.u32 %v284_v38, 7  ;;  %v478_v38 = vld [vmem:[#allocation5 + $0xf0] sm:$0xff] }
  0xad   :  { %216 = vmatpush.msra.mxu2 %v92_v62 }
  0xae   :  { %vm286_vm1 = vcmp.eq.s32.totalorder %v1061_v54, 0  ;;  %vm654_vm10 = vcmp.eq.s32.totalorder %v1061_v54, 1 }
  0xaf   :  { %217 = vmatpush.msra.mxu2 %v90_v2 }
  0xb1   :  { %v166_v50 = vpop.f32.mrf.mxu0 }
  0xb2   :  { %v1041_v60 = vadd.f32 %v195_v46, %v166_v50 }
  0xb3   :  { %v201_v4 = vpop.f32.mrf.mxu1 }
  0xb4   :  { %v272_v3 = vmul.f32 %v1041_v60, %v1041_v60  ;;  %v262_v7 = vadd.f32 %v1041_v60, %v1043_v63 }
  0xb6   :  { %v275_v11 = vadd.f32 %v272_v3, %v271_v6  ;;  %v122_v3 = vld [vmem:[#allocation2 + $0x128] sm:$0xff] }
  0xb7   :  { %246 = vmatpush.msra.mxu3 %v122_v3  ;;  %v86_v6 = vld [vmem:[#allocation2 + $0x8] sm:$0xff] }
  0xb9   :  { %v169_v58 = vpop.f32.mrf.mxu0  ;;  %247 = vmatpush.msra.mxu3 %v120_v5 }
  0xba   :  { %v1045_v0 = vadd.f32 %v198_v52, %v169_v58 }
  0xbc   :  { %v273_v8 = vmul.f32 %v1045_v0, %v1045_v0  ;;  %v263_v12 = vadd.f32 %v262_v7, %v1045_v0  ;;  %v118_v7 = vld [vmem:[#allocation2 + $0x108] sm:$0xff] }
  0xbd   :  { %248 = vmatpush.msra.mxu3 %v118_v7  ;;  %v468_v7 = vld [vmem:[#allocation5 + $0xa0] sm:$0xff] }
  0xbe   :  { %v276_v15 = vadd.f32 %v275_v11, %v273_v8  ;;  %734 = vmatmul.msk.f32.vlgmr.msra.gmra.mxu3 %vm133_vm0, %v896_v18  ;;  %v1081_v18 = vld [vmem:[%s1200_s5] sm:$0xff] }
  0xbf   :  { %355 = vmatpush.msrb.mxu3 %v1081_v18 }
  0xc1   :  { %v172_v9 = vpop.f32.mrf.mxu0 }
  0xc2   :  { %v1056_v13 = vadd.f32 %v201_v4, %v172_v9  ;;  %v88_v4 = vld [vmem:[#allocation2 + $0x18] sm:$0xff] }
  0xc3   :  { %218 = vmatpush.msra.mxu2 %v88_v4 }
  0xc4   :  { %v264_v16 = vadd.f32 %v263_v12, %v1056_v13  ;;  %v274_v17 = vmul.f32 %v1056_v13, %v1056_v13 }
  0xc5   :  { %219 = vmatpush.msra.mxu2 %v86_v6 }
  0xc6   :  { %v265_v20 = vrot.slane %v264_v16, 4  ;;  %v277_v21 = vadd.f32 %v276_v15, %v274_v17  ;;  %220 = vmatmul.f32.vlgmr.msra.gmra.mxu2 %v910_v26  ;;  %735 = vmatmul.msk.f32.gmra.mxu3 %vm133_vm0, %v903_v23 }
  0xc8   :  { %v266_v24 = vadd.f32 %v265_v20, %v264_v16  ;;  %v278_v25 = vrot.slane %v277_v21, 4 }
  0xca   :  { %v267_v46 = vrot.slane %v266_v24, 2  ;;  %v279_v50 = vadd.f32 %v278_v25, %v277_v21  ;;  %v479_v25 = vld [vmem:[#allocation5 + $0xf8] sm:$0xff] }
  0xcb   :  { %525 = vmatpush.msrb.mxu2 %v479_v25  ;;  %v462_v25 = vld [vmem:[#allocation5 + $0x70] sm:$0xff] }
  0xcc   :  { %v268_v52 = vadd.f32 %v267_v46, %v266_v24  ;;  %v280_v53 = vrot.slane %v279_v50, 2  ;;  %v476_v46 = vld [vmem:[#allocation5 + $0xe0] sm:$0xff] }
  0xcd   :  { %526 = vmatpush.msrb.mxu2 %v478_v38  ;;  %v461_v38 = vld [vmem:[#allocation5 + $0x68] sm:$0xff] }
  0xce   :  { %v269_v55 = vrot.slane %v268_v52, 1  ;;  %v281_v56 = vadd.f32 %v280_v53, %v279_v50  ;;  %223 = vmatmul.f32.gmra.mxu2 %v923_v28  ;;  %736 = vmatmul.msk.f32.gmra.mxu3 %vm133_vm0, %v916_v27  ;;  %v475_v50 = vld [vmem:[#allocation5 + $0xd8] sm:$0xff]  ;;  %v473_v53 = vld [vmem:[#allocation5 + $0xc8] sm:$0xff] }
  0xcf   :  { %527 = vmatpush.msrb.mxu2 %v477_v43  ;;  %v460_v43 = vld [vmem:[#allocation5 + $0x60] sm:$0xff] }
  0xd0   :  { %v282_v57 = vrot.slane %v281_v56, 1  ;;  %v270_v58 = vadd.f32 %v269_v55, %v268_v52  ;;  %v474_v52 = vld [vmem:[#allocation5 + $0xd0] sm:$0xff]  ;;  %v472_v55 = vld [vmem:[#allocation5 + $0xc0] sm:$0xff] }
  0xd1   :  { %528 = vmatpush.msrb.mxu2 %v476_v46  ;;  %v378_v46 = vld [vmem:[%s1198_s3 + $0x20] sm:$0xff] }
  0xd2   :  { %v283_v59 = vadd.f32 %v282_v57, %v281_v56  ;;  %v471_v56 = vld [vmem:[#allocation5 + $0xb8] sm:$0xff]  ;;  %v470_v57 = vld [vmem:[#allocation5 + $0xb0] sm:$0xff] }
  0xd3   :  { %529 = vmatpush.msrb.mxu2 %v475_v50  ;;  %v459_v50 = vld [vmem:[#allocation5 + $0x58] sm:$0xff] }
  0xd4   :  { %v287_v61 = vsel %vm286_vm1, %v270_v58, %v283_v59  ;;  %v469_v58 = vld [vmem:[#allocation5 + $0xa8] sm:$0xff] }
  0xd5   :  { %304 = vmatmul.f32.vlgmr.msrb.gmra.mxu1 %v287_v61  ;;  %530 = vmatpush.msrb.mxu2 %v474_v52  ;;  %v458_v52 = vld [vmem:[#allocation5 + $0x50] sm:$0xff] }
  0xd6   :  { %226 = vmatmul.f32.gmra.mxu2 %v936_v30  ;;  %737 = vmatmul.msk.f32.gmra.mxu3 %vm133_vm0, %v929_v29  ;;  %v1087_v29 = vld [vmem:[%s1201_s6] sm:$0x1f] }
  0xd7   :  { %531 = vmatpush.msrb.mxu2 %v473_v53  ;;  %v457_v53 = vld [vmem:[#allocation5 + $0x48] sm:$0xff] }
  0xd9   :  { %532 = vmatpush.msrb.mxu2 %v472_v55  ;;  %v456_v55 = vld [vmem:[#allocation5 + $0x40] sm:$0xff] }
  0xdb   :  { %533 = vmatpush.msrb.mxu2 %v471_v56  ;;  %v379_v56 = vld [vmem:[%s1198_s3 + $0x28] sm:$0xff] }
  0xdd   :  { %534 = vmatpush.msrb.mxu2 %v470_v57  ;;  %v455_v57 = vld [vmem:[#allocation5 + $0x38] sm:$0xff] }
  0xde   :  { %229 = vmatmul.f32.gmra.mxu2 %v942_v31 }
  0xdf   :  { %535 = vmatpush.msrb.mxu2 %v469_v58  ;;  %v454_v58 = vld [vmem:[#allocation5 + $0x30] sm:$0xff] }
  0xe1   :  { %536 = vmatpush.msrb.mxu2 %v468_v7  ;;  %v381_v7 = vld [vmem:[%s1198_s3 + $0x38] sm:$0xff] }
 0x141   :  { %v250_v61 = vpop.f32.mrf.mxu3 }
 0x149   :  { %v221_v59 = vpop.f32.mrf.mxu2  ;;  %v253_v2 = vpop.f32.mrf.mxu3 }
 0x14a   :  { %v1094_v62 = vadd.f32 %v250_v61, %v221_v59  ;;  %v453_v59 = vld [vmem:[#allocation5 + $0x28] sm:$0xff]  ;;  %v452_v61 = vld [vmem:[#allocation5 + $0x20] sm:$0xff] }
 0x151   :  { %v224_v1 = vpop.f32.mrf.mxu2  ;;  %v256_v5 = vpop.f32.mrf.mxu3 }
 0x152   :  { %v305_v8 = vpop.f32.mrf.mxu1  ;;  %v1096_v3 = vadd.f32 %v253_v2, %v224_v1  ;;  %v380_v1 = vld [vmem:[%s1198_s3 + $0x30] sm:$0xff]  ;;  %v451_v2 = vld [vmem:[#allocation5 + $0x18] sm:$0xff] }
 0x153   :  { %v308_v26 = vmul.f32 %v305_v8, %v305_v8 }
 0x155   :  { %v310_v9 = vrot.slane %v308_v26, 7  ;;  %v466_v26 = vld [vmem:[#allocation5 + $0x90] sm:$0xff] }
 0x157   :  { %v312_v10 = vsub.f32 %v305_v8, %v310_v9  ;;  %v465_v9 = vld [vmem:[#allocation5 + $0x88] sm:$0xff] }
 0x159   :  { %v313_v23 = vadd.f32 1e-05, %v312_v10  ;;  %v227_v4 = vpop.f32.mrf.mxu2  ;;  %v464_v10 = vld [vmem:[#allocation5 + $0x80] sm:$0xff] }
 0x15a   :  { %v1098_v6 = vadd.f32 %v256_v5, %v227_v4  ;;  %v450_v4 = vld [vmem:[#allocation5 + $0x10] sm:$0xff]  ;;  %v449_v5 = vld [vmem:[#allocation5 + $0x8] sm:$0xff] }
 0x15b   :  { %755 = vrsqrt.f32 %v313_v23  ;;  %vm320_vm3 = vweird.f32 %v313_v23 }
 0x161   :  { %v756_v28 = vpop.eup %755 }
 0x162   :  { %v315_v27 = vmul.f32 %v756_v28, %v313_v23  ;;  %vm321_vm2 = vweird.f32 %v756_v28  ;;  %v1101_v23 = vpop.f32.mrf.mxu3 }
 0x163   :  { %vm322_vm4 = vmor %vm320_vm3, %vm321_vm2 }
 0x164   :  { %v316_v30 = vmul.f32 %v756_v28, %v315_v27 }
 0x166   :  { %v317_v11 = vmul.f32 0.5, %v316_v30 }
 0x168   :  { %v318_v31 = vsub.f32 1.5, %v317_v11 }
 0x16a   :  { %v319_v12 = vmul.f32 %v756_v28, %v318_v31 }
 0x16c   :  { %v323_v14 = vsel %vm322_vm4, %v756_v28, %v319_v12 }
 0x16d   :  { %v325_v15 = vrot.slane %v323_v14, 1 }
 0x16f   :  { %v327_v16 = vmul.f32 %v325_v15, %v1087_v29 }
 0x171   :  { %v328_v17 = vmul.f32 %v327_v16, %v305_v8  ;;  %v333_v21 = vperm.slane %v327_v16, 0  ;;  %v467_v8 = vld [vmem:[#allocation5 + $0x98] sm:$0xff] }
 0x172   :  { %537 = vmatpush.msrb.mxu2 %v467_v8  ;;  %v448_v8 = vld [vmem:[#allocation5] sm:$0xff] }
 0x173   :  { %v330_v19 = vrot.slane %v328_v17, 7 }
 0x174   :  { %538 = vmatpush.msrb.mxu2 %v466_v26  ;;  %v495_v26 = vld [vmem:[#allocation5 + $0x178] sm:$0xff] }
 0x175   :  { %v332_v20 = vsub.f32 %v1087_v29, %v330_v19  ;;  %554 = vmatpush.msra.mxu3 %v495_v26 }
 0x176   :  { %539 = vmatpush.msrb.mxu2 %v465_v9  ;;  %v494_v9 = vld [vmem:[#allocation5 + $0x170] sm:$0xff] }
 0x177   :  { %v334_v22 = vperm.slane %v332_v20, 1  ;;  %555 = vmatpush.msra.mxu3 %v494_v9 }
 0x178   :  { %540 = vmatpush.msrb.mxu2 %v464_v10  ;;  %v493_v10 = vld [vmem:[#allocation5 + $0x168] sm:$0xff] }
 0x179   :  { %v335_v24 = vsel %vm286_vm1, %v333_v21, %v334_v22  ;;  %556 = vmatpush.msra.mxu3 %v493_v10 }
 0x17a   :  { %738 = vmatmul.msk.f32.vlgmr.msrb.gmra.mxu3 %vm336_vm5, %v335_v24  ;;  %678 = vmatpush.msra.mxu2 %v1081_v18  ;;  %v463_v24 = vld [vmem:[#allocation5 + $0x78] sm:$0xff] }
 0x17b   :  { %496 = vmatpush.msrb.mxu0 %v463_v24 }
 0x17d   :  { %497 = vmatpush.msrb.mxu0 %v462_v25 }
 0x17f   :  { %498 = vmatpush.msrb.mxu0 %v461_v38 }
 0x181   :  { %499 = vmatpush.msrb.mxu0 %v460_v43 }
 0x183   :  { %500 = vmatpush.msrb.mxu0 %v459_v50 }
 0x185   :  { %501 = vmatpush.msrb.mxu0 %v458_v52 }
 0x187   :  { %502 = vmatpush.msrb.mxu0 %v457_v53 }
 0x189   :  { %503 = vmatpush.msrb.mxu0 %v456_v55 }
 0x18b   :  { %504 = vmatpush.msrb.mxu0 %v455_v57 }
 0x18d   :  { %505 = vmatpush.msrb.mxu0 %v454_v58 }
 0x18f   :  { %506 = vmatpush.msrb.mxu0 %v453_v59 }
 0x191   :  { %507 = vmatpush.msrb.mxu0 %v452_v61 }
 0x193   :  { %508 = vmatpush.msrb.mxu0 %v451_v2 }
 0x195   :  { %509 = vmatpush.msrb.mxu0 %v450_v4 }
 0x197   :  { %510 = vmatpush.msrb.mxu0 %v449_v5 }
 0x199   :  { %511 = vmatpush.msrb.mxu0 %v448_v8 }
 0x19b   :  { %606 = vmatpush.msra.mxu0 %v948_v32  ;;  %v488_v32 = vld [vmem:[#allocation5 + $0x140] sm:$0xff] }
 0x19d   :  { %607 = vmatpush.msra.mxu0 %v954_v33  ;;  %v487_v33 = vld [vmem:[#allocation5 + $0x138] sm:$0xff] }
 0x19f   :  { %608 = vmatpush.msra.mxu0 %v960_v34  ;;  %v486_v34 = vld [vmem:[#allocation5 + $0x130] sm:$0xff] }
 0x1a1   :  { %609 = vmatpush.msra.mxu0 %v966_v35  ;;  %v485_v35 = vld [vmem:[#allocation5 + $0x128] sm:$0xff] }
 0x1a3   :  { %610 = vmatpush.msra.mxu0 %v972_v36  ;;  %v484_v36 = vld [vmem:[#allocation5 + $0x120] sm:$0xff] }
 0x1a5   :  { %611 = vmatpush.msra.mxu0 %v978_v37  ;;  %v483_v37 = vld [vmem:[#allocation5 + $0x118] sm:$0xff] }
 0x1a7   :  { %612 = vmatpush.msra.mxu0 %v984_v39  ;;  %v482_v39 = vld [vmem:[#allocation5 + $0x110] sm:$0xff] }
 0x1a9   :  { %613 = vmatpush.msra.mxu0 %v990_v40  ;;  %v481_v40 = vld [vmem:[#allocation5 + $0x108] sm:$0xff] }
 0x1ab   :  { %614 = vmatpush.msra.mxu0 %v996_v41  ;;  %v480_v41 = vld [vmem:[#allocation5 + $0x100] sm:$0xff] }
 0x1ad   :  { %615 = vmatpush.msra.mxu0 %v1002_v42 }
 0x1af   :  { %616 = vmatpush.msra.mxu0 %v1008_v44 }
 0x1b1   :  { %617 = vmatpush.msra.mxu0 %v1014_v45 }
 0x1b3   :  { %618 = vmatpush.msra.mxu0 %v1019_v47 }
 0x1b5   :  { %619 = vmatpush.msra.mxu0 %v1025_v48 }
 0x1b7   :  { %620 = vmatpush.msra.mxu0 %v1031_v49 }
 0x1b9   :  { %621 = vmatpush.msra.mxu0 %v1037_v51 }
 0x1fd   :  { %v357_v28 = vpop.f32.mrf.mxu3 }
 0x1fe   :  { %v360_v27 = vperm.slane %v357_v28, 0  ;;  %v365_v30 = vperm.slane %v357_v28, 1  ;;  %v492_v28 = vld [vmem:[#allocation5 + $0x160] sm:$0xff] }
 0x1ff   :  { %557 = vmatpush.msra.mxu3 %v492_v28 }
 0x200   :  { %v364_v11 = vmul.f32 %v360_v27, %v1056_v13  ;;  %v361_v31 = vmul.f32 %v360_v27, %v1043_v63  ;;  %v363_v12 = vmul.f32 %v360_v27, %v1045_v0  ;;  %v362_v14 = vmul.f32 %v360_v27, %v1041_v60  ;;  %v374_v63 = vld [vmem:[%s1198_s3] sm:$0xff]  ;;  %v375_v60 = vld [vmem:[%s1198_s3 + $0x8] sm:$0xff]  ;;  %v376_v0 = vld [vmem:[%s1198_s3 + $0x10] sm:$0xff] }
 0x201   :  { %v377_v13 = vld [vmem:[%s1198_s3 + $0x18] sm:$0xff]  ;;  %s843_s3 = smov [#allocation7]  }
 0x202   :  { %v369_v15 = vadd.f32 %v365_v30, %v364_v11  ;;  %v366_v16 = vadd.f32 %v365_v30, %v361_v31  ;;  %v368_v17 = vadd.f32 %v365_v30, %v363_v12  ;;  %v367_v21 = vadd.f32 %v365_v30, %v362_v14  ;;  %v491_v27 = vld [vmem:[#allocation5 + $0x158] sm:$0xff]  ;;  %v490_v30 = vld [vmem:[#allocation5 + $0x150] sm:$0xff]  ;;  %v489_v11 = vld [vmem:[#allocation5 + $0x148] sm:$0xff]  ;;  %v1155_v14 = vpop.f32.mrf.mxu2  ;;  %s714_s30 = sshll.u32 %s843_s3, 4  ;;  %s715_s30 = int_to_ptr.vmem [resolvable:$true] %s714_s30 }
 0x203   :  { %558 = vmatpush.msra.mxu3 %v491_v27 }
 0x204   :  { %v373_v19 = vmax.f32 %v369_v15, 0.0  ;;  %v370_v20 = vmax.f32 %v366_v16, 0.0  ;;  %v372_v18 = vmax.f32 %v368_v17, 0.0  ;;  %v371_v22 = vmax.f32 %v367_v21, 0.0 }
 0x205   :  { %559 = vmatpush.msra.mxu3 %v490_v30 }
 0x206   :  { %419 = vmatpush.msra.mxu1 %v373_v19  ;;  %541 = vmatmul.f32.vlgmr.msrb.gmra.mxu2 %v370_v20 }
 0x207   :  { %560 = vmatpush.msra.mxu3 %v489_v11 }
 0x208   :  { %420 = vmatpush.msra.mxu1 %v372_v18 }
 0x209   :  { %561 = vmatpush.msra.mxu3 %v488_v32 }
 0x20a   :  { %421 = vmatpush.msra.mxu1 %v371_v22 }
 0x20b   :  { %562 = vmatpush.msra.mxu3 %v487_v33 }
 0x20c   :  { %422 = vmatpush.msra.mxu1 %v370_v20 }
 0x20d   :  { %739 = vmatmul.msk.f32.vlgmr.msra.gmra.mxu1 %vm382_vm6, %v374_v63  ;;  %563 = vmatpush.msra.mxu3 %v486_v34 }
 0x20e   :  { %544 = vmatmul.f32.gmra.mxu2 %v371_v22 }
 0x20f   :  { %564 = vmatpush.msra.mxu3 %v485_v35 }
 0x211   :  { %565 = vmatpush.msra.mxu3 %v484_v36 }
 0x213   :  { %566 = vmatpush.msra.mxu3 %v483_v37 }
 0x215   :  { %740 = vmatmul.msk.f32.gmra.mxu1 %vm382_vm6, %v375_v60  ;;  %567 = vmatpush.msra.mxu3 %v482_v39 }
 0x216   :  { %547 = vmatmul.f32.gmra.mxu2 %v372_v18 }
 0x217   :  { %568 = vmatpush.msra.mxu3 %v481_v40 }
 0x219   :  { %569 = vmatpush.msra.mxu3 %v480_v41 }
 0x21d   :  { %741 = vmatmul.msk.f32.gmra.mxu1 %vm382_vm6, %v376_v0 }
 0x21e   :  { %550 = vmatmul.f32.gmra.mxu2 %v373_v19 }
 0x225   :  { %742 = vmatmul.msk.f32.gmra.mxu1 %vm382_vm6, %v377_v13 }
 0x22d   :  { %743 = vmatmul.msk.f32.gmra.mxu1 %vm382_vm6, %v378_v46 }
 0x235   :  { %744 = vmatmul.msk.f32.gmra.mxu1 %vm382_vm6, %v379_v56 }
 0x23d   :  { %745 = vmatmul.msk.f32.gmra.mxu1 %vm382_vm6, %v380_v1 }
 0x245   :  { %746 = vmatmul.msk.f32.gmra.mxu1 %vm382_vm6, %v381_v7 }
 0x289   :  { %v542_v15 = vpop.f32.mrf.mxu2 }
 0x28a   :  { %v424_v42 = vpop.f32.mrf.mxu1 }
 0x28b   :  { %512 = vmatmul.f32.vlgmr.msrb.gmra.mxu0 %v424_v42 }
 0x291   :  { %v545_v19 = vpop.f32.mrf.mxu2 }
 0x292   :  { %v427_v44 = vpop.f32.mrf.mxu1 }
 0x293   :  { %515 = vmatmul.f32.gmra.mxu0 %v427_v44 }
 0x299   :  { %v548_v18 = vpop.f32.mrf.mxu2 }
 0x29a   :  { %v430_v45 = vpop.f32.mrf.mxu1 }
 0x29b   :  { %518 = vmatmul.f32.gmra.mxu0 %v430_v45 }
 0x2a1   :  { %v551_v46 = vpop.f32.mrf.mxu2 }
 0x2a2   :  { %v433_v31 = vpop.f32.mrf.mxu1 }
 0x2a3   :  { %521 = vmatmul.f32.gmra.mxu0 %v433_v31 }
 0x2aa   :  { %v436_v47 = vpop.f32.mrf.mxu1 }
 0x2ab   :  { %570 = vmatmul.f32.vlgmr.msra.gmra.mxu3 %v436_v47 }
 0x2b2   :  { %v439_v12 = vpop.f32.mrf.mxu1 }
 0x2b3   :  { %573 = vmatmul.f32.gmra.mxu3 %v439_v12 }
 0x2ba   :  { %v442_v48 = vpop.f32.mrf.mxu1 }
 0x2bb   :  { %576 = vmatmul.f32.gmra.mxu3 %v442_v48 }
 0x2c2   :  { %v445_v49 = vpop.f32.mrf.mxu1 }
 0x2c3   :  { %579 = vmatmul.f32.gmra.mxu3 %v445_v49 }
 0x308   :  { %v513_v51 = vpop.f32.mrf.mxu0 }
 0x309   :  { %v543_v60 = vadd.f32 %v542_v15, %v513_v51 }
 0x310   :  { %v516_v16 = vpop.f32.mrf.mxu0 }
 0x311   :  { %v546_v22 = vadd.f32 %v545_v19, %v516_v16  ;;  %v656_v19 = vperm.slane %v1087_v29, 4 }
 0x318   :  { %v519_v21 = vpop.f32.mrf.mxu0 }
 0x319   :  { %v549_v0 = vadd.f32 %v548_v18, %v519_v21 }
 0x320   :  { %v522_v38 = vpop.f32.mrf.mxu0 }
 0x321   :  { %v552_v50 = vadd.f32 %v551_v46, %v522_v38 }
 0x32e   :  { %v571_v17 = vpop.f32.mrf.mxu3 }
 0x32f   :  { %v1159_v24 = vadd.f32 %v571_v17, %v543_v60 }
 0x331   :  { %v592_v52 = vmul.f32 %v1159_v24, %v1159_v24 }
 0x336   :  { %v574_v20 = vpop.f32.mrf.mxu3 }
 0x337   :  { %v1157_v13 = vadd.f32 %v574_v20, %v546_v22 }
 0x339   :  { %v593_v43 = vmul.f32 %v1157_v13, %v1157_v13  ;;  %v583_v53 = vadd.f32 %v1157_v13, %v1159_v24 }
 0x33b   :  { %v596_v57 = vadd.f32 %v593_v43, %v592_v52 }
 0x33e   :  { %v577_v63 = vpop.f32.mrf.mxu3 }
 0x33f   :  { %v1161_v25 = vadd.f32 %v577_v63, %v549_v0 }
 0x341   :  { %v594_v55 = vmul.f32 %v1161_v25, %v1161_v25  ;;  %v584_v58 = vadd.f32 %v583_v53, %v1161_v25 }
 0x343   :  { %v597_v61 = vadd.f32 %v596_v57, %v594_v55 }
 0x346   :  { %v580_v56 = vpop.f32.mrf.mxu3 }
 0x347   :  { %v581_v59 = vadd.f32 %v580_v56, %v552_v50  ;;  %v260_v50 = vadd.f32 %v1101_v23, %v1155_v14 }
 0x349   :  { %v585_v1 = vadd.f32 %v584_v58, %v581_v59  ;;  %v595_v2 = vmul.f32 %v581_v59, %v581_v59 }
 0x34b   :  { %v586_v4 = vrot.slane %v585_v1, 4  ;;  %v598_v5 = vadd.f32 %v597_v61, %v595_v2 }
 0x34d   :  { %v587_v7 = vadd.f32 %v586_v4, %v585_v1  ;;  %v599_v8 = vrot.slane %v598_v5, 4 }
 0x34f   :  { %v588_v26 = vrot.slane %v587_v7, 2  ;;  %v600_v9 = vadd.f32 %v599_v8, %v598_v5 }
 0x351   :  { %v589_v10 = vadd.f32 %v588_v26, %v587_v7  ;;  %v601_v28 = vrot.slane %v600_v9, 2 }
 0x353   :  { %v590_v27 = vrot.slane %v589_v10, 1  ;;  %v602_v30 = vadd.f32 %v601_v28, %v600_v9 }
 0x355   :  { %v603_v11 = vrot.slane %v602_v30, 1  ;;  %v591_v32 = vadd.f32 %v590_v27, %v589_v10 }
 0x357   :  { %v604_v33 = vadd.f32 %v603_v11, %v602_v30 }
 0x359   :  { %v605_v34 = vsel %vm286_vm1, %v591_v32, %v604_v33 }
 0x35a   :  { %622 = vmatmul.f32.vlgmr.msra.gmra.mxu0 %v605_v34 }
 0x3d7   :  { %v623_v35 = vpop.f32.mrf.mxu0 }
 0x3d8   :  { %v626_v36 = vmul.f32 %v623_v35, %v623_v35 }
 0x3da   :  { %v628_v37 = vrot.slane %v626_v36, 7 }
 0x3dc   :  { %v630_v39 = vsub.f32 %v623_v35, %v628_v37 }
 0x3de   :  { %v631_v40 = vadd.f32 1e-05, %v630_v39 }
 0x3e0   :  { %757 = vrsqrt.f32 %v631_v40  ;;  %vm638_vm8 = vweird.f32 %v631_v40 }
 0x3e6   :  { %v758_v41 = vpop.eup %757 }
 0x3e7   :  { %v633_v42 = vmul.f32 %v758_v41, %v631_v40  ;;  %vm639_vm7 = vweird.f32 %v758_v41 }
 0x3e8   :  { %vm640_vm9 = vmor %vm638_vm8, %vm639_vm7 }
 0x3e9   :  { %v634_v44 = vmul.f32 %v758_v41, %v633_v42 }
 0x3eb   :  { %v635_v45 = vmul.f32 0.5, %v634_v44 }
 0x3ed   :  { %v636_v31 = vsub.f32 1.5, %v635_v45 }
 0x3ef   :  { %v637_v47 = vmul.f32 %v758_v41, %v636_v31 }
 0x3f1   :  { %v641_v12 = vsel %vm640_vm9, %v758_v41, %v637_v47 }
 0x3f2   :  { %v643_v48 = vrot.slane %v641_v12, 7 }
 0x3f4   :  { %v645_v49 = vmul.f32 %v643_v48, %v1087_v29 }
 0x3f6   :  { %v647_v51 = vrot.slane %v645_v49, 2  ;;  %v658_v21 = vperm.slane %v645_v49, 2 }
 0x3f8   :  { %v649_v15 = vmul.f32 %v647_v51, %v623_v35 }
 0x3fa   :  { %v651_v16 = vrot.slane %v649_v15, 5 }
 0x3fc   :  { %v653_v17 = vsub.f32 %v1087_v29, %v651_v16 }
 0x3fe   :  { %v655_v20 = vperm.slane %v653_v17, 3 }
 0x400   :  { %v657_v18 = vsel %vm654_vm10, %v655_v20, %v656_v19 }
 0x401   :  { %v659_v22 = vsel %vm286_vm1, %v658_v21, %v657_v18 }
 0x402   :  { %747 = vmatmul.msk.f32.vlgmr.msra.gmra.mxu2 %vm336_vm5, %v659_v22 }
 0x485   :  { %v680_v63 = vpop.f32.mrf.mxu2 }
 0x486   :  { %v683_v60 = vperm.slane %v680_v63, 0  ;;  %v688_v0 = vperm.slane %v680_v63, 1  ;;  %v697_v56 = vperm.slane %v680_v63, 2 }
 0x488   :  { %v684_v38 = vmul.f32 %v683_v60, %v1159_v24  ;;  %v685_v43 = vmul.f32 %v683_v60, %v1157_v13  ;;  %v686_v46 = vmul.f32 %v683_v60, %v1161_v25  ;;  %v687_v29 = vmul.f32 %v683_v60, %v581_v59 }
 0x48a   :  { %v689_v52 = vadd.f32 %v688_v0, %v684_v38  ;;  %v690_v53 = vadd.f32 %v688_v0, %v685_v43  ;;  %v691_v55 = vadd.f32 %v688_v0, %v686_v46  ;;  %v692_v54 = vadd.f32 %v688_v0, %v687_v29 }
 0x48c   :  { %v693_v57 = vadd.f32 %v689_v52, %v1094_v62  ;;  %v694_v58 = vadd.f32 %v690_v53, %v1096_v3  ;;  %v695_v61 = vadd.f32 %v691_v55, %v1098_v6  ;;  %v696_v24 = vadd.f32 %v692_v54, %v260_v50 }
 0x48e   :  { %v698_v1 = vadd.f32 %v697_v56, %v693_v57  ;;  %v699_v13 = vadd.f32 %v697_v56, %v694_v58  ;;  %v700_v2 = vadd.f32 %v697_v56, %v695_v61  ;;  %v701_v25 = vadd.f32 %v697_v56, %v696_v24 }
 0x490   :  { %v702_v59 = vmax.f32 %v698_v1, 0.0  ;;  %v703_v4 = vmax.f32 %v699_v13, 0.0  ;;  %v704_v5 = vmax.f32 %v700_v2, 0.0  ;;  %v705_v23 = vmax.f32 %v701_v25, 0.0 }
 0x492   :  { %706 = vst [vmem:[#allocation7] sm:$0xff] %v702_v59 }
 0x493   :  { %707 = vst [vmem:[#allocation7 + $0x8] sm:$0xff] %v703_v4 }
 0x494   :  { %708 = vst [vmem:[#allocation7 + $0x10] sm:$0xff] %v704_v5 }
 0x495   :  { %709 = vst [vmem:[#allocation7 + $0x18] sm:$0xff] %v705_v23 }
 0x496   :  { %722 = dma.vmem_to_hbm [thread:$0]  %s715_s30, 512, %s717_s10, [#allocation4], %s841_s13, %s841_s13, %s842_s14  }
 0x497   :  { %835 = dma.done.wait [#allocation4], 512  }
 0x498   :  { %836 = vsyncadd [#allocation4], 4294966784 }
 0x499   :  { %727 = vsyncpa [#allocation3], 1 }
 0x49a   :  { %728 = vsyncpa [#allocation6], 1 }
 0x49b   :  { %729 = vsyncpa [#allocation4], 1 }

</bundles_post_ra>
